<compile_context>
chip_gen: v7x
topology: tpu7x:2x2x1
jax: 0.10.0
libtpu: 0.0.40
codegen_flags: <defaults>
</compile_context>

<pallas_src>
import math

import jax
import jax.numpy as jnp
from jax.experimental import pallas as pl
from jax.experimental.pallas import tpu as pltpu

_INV_SQRT2 = 1.0 / math.sqrt(2.0)


def mlp_kernel(x_ref, w1t_ref, b1_ref, w2t_ref, b2_ref, o_ref):
    # MXU operands in the weights' dtype (bf16 fast path when enabled in the
    # wrapper); accumulation, bias add and GELU stay in f32.
    x = x_ref[...].astype(w1t_ref.dtype)                       # (tm, D)

    # Linear 1: x @ W1^T + b1  (weights already transposed in the wrapper).
    h = jnp.dot(x, w1t_ref[...], preferred_element_type=jnp.float32) + b1_ref[...]

    # Exact GELU (nn.GELU default), in f32: 0.5*h*(1+erf(h/sqrt(2))).
    h = 0.5 * h * (1.0 + jax.lax.erf(h * _INV_SQRT2))

    # Linear 2: h @ W2^T + b2.  Note: for bf16 MXU operands this downcasts the
    # GELU output to bf16 before the second matmul (documented precision hit).
    y = jnp.dot(h.astype(w2t_ref.dtype), w2t_ref[...],
                preferred_element_type=jnp.float32) + b2_ref[...]

    o_ref[...] = y.astype(o_ref.dtype)


def _round_up(n, m):
    return ((n + m - 1) // m) * m


def _pick_tm(M, itemsize):
    """Row-tile size: aligned for the MXU/vreg, >=2 grid steps for medium M."""
    row_align = 16 if itemsize == 2 else 8      # bf16 packs 16 rows per vreg
    if M <= 128:
        return _round_up(max(M, row_align), row_align)
    if M <= 1024:
        # >= 2 grid steps so megacore / both v7x TensorCores get work;
        # 128-aligned so M tiles don't waste MXU systolic passes.
        return max(128, _round_up(pl.cdiv(M, 2), 128))
    return 512


def mlp_forward(x, w1, b1, w2, b2, *, tm=None, use_bf16_matmul=False):
    """y = GELU(x @ W1^T + b1) @ W2^T + b2 over the last dim of x (eval-mode MLP)."""
    orig_shape = x.shape
    D = orig_shape[-1]
    x2 = x.reshape(-1, D)
    M = x2.shape[0]
    dt = x2.dtype
    itemsize = jnp.dtype(dt).itemsize

    # Opt-in bf16 MXU operands (the MXU has no native f32 mode; f32 matmul is
    # emulated with multiple bf16 passes).  f32 accumulation is kept either way.
    mxu_dt = jnp.bfloat16 if use_bf16_matmul else dt
    w_itemsize = jnp.dtype(mxu_dt).itemsize

    if tm is None:
        tm = _pick_tm(M, itemsize)
    tm = _round_up(tm, 8)
    grid_m = pl.cdiv(M, tm)     # partial last row block is masked by Pallas

    # Pre-transpose + cast parameters ONCE here (no per-tile XLU transpose
    # inside the kernel).  No zero padding needed: block last dims == D.
    w1t = w1.T.astype(mxu_dt)
    w2t = w2.T.astype(mxu_dt)
    b1r = b1.astype(jnp.float32).reshape(1, D)
    b2r = b2.astype(jnp.float32).reshape(1, D)

    # Single-buffer the constant-index weight/bias blocks when the weights are
    # big enough for the double-buffer copy to matter (VMEM saving, key on v7x).
    w_bytes = D * D * w_itemsize
    const_block_kwargs = (
        dict(pipeline_mode=pl.Buffered(1)) if w_bytes > (1 << 20) else {}
    )
    wbuf = 1 if const_block_kwargs else 2

    # VMEM footprint estimate (weights resident, x/y row tiles double-buffered,
    # f32 intermediates for one tile).
    vmem_bytes = (2 * wbuf * w_bytes               # W1^T, W2^T
                  + 2 * 2 * tm * D * itemsize      # x tile in, y tile out (x2 buffers)
                  + 2 * wbuf * D * 4               # biases (f32)
                  + 2 * tm * D * 4)                # f32 intermediates (h, y)

    # Generation-aware scoped-VMEM limit: ~112 MiB on v5e/v6e (128 MiB
    # physical), ~56 MiB on v7x (64 MiB physical).  Always set explicitly
    # (v5e's default scoped limit is only 16 MiB).
    try:
        vmem_cap = int(pltpu.get_tpu_info().vmem_capacity_bytes)
    except Exception:
        vmem_cap = 64 << 20          # conservative fallback: v7x physical VMEM
    vmem_headroom_cap = vmem_cap - max(8 << 20, vmem_cap // 8)
    if vmem_bytes > vmem_headroom_cap:
        # TODO(synk): implement streamed N/K weight tiling with a VMEM f32
        # accumulator for D too large for resident weights (esp. v7x).
        raise NotImplementedError(
            f"MLP weights for D={D} need ~{vmem_bytes >> 20} MiB VMEM "
            f"(> {vmem_headroom_cap >> 20} MiB budget); weight tiling not implemented.")
    vmem_limit = int(min(max(vmem_bytes + (8 << 20), 32 << 20), vmem_headroom_cap))

    cost = pl.CostEstimate(
        flops=2 * 2 * M * D * D,                    # two (M,D)x(D,D) matmuls
        transcendentals=M * D,                      # erf
        bytes_accessed=(2 * M * D * itemsize        # x in, y out
                        + 2 * D * D * w_itemsize    # weights
                        + 2 * D * 4),               # biases
    )

    out = pl.pallas_call(
        mlp_kernel,
        out_shape=jax.ShapeDtypeStruct((M, D), dt),
        grid_spec=pltpu.PrefetchScalarGridSpec(
            num_scalar_prefetch=0,
            grid=(grid_m,),
            in_specs=[
                # x row tiles streamed from HBM.  (If a profile ever shows
                # exposed DMA on this lone axis, pipeline_mode=pl.Buffered(3)
                # here is the cheap knob.)
                pl.BlockSpec((tm, D), lambda i: (i, 0)),
                pl.BlockSpec((D, D), lambda i: (0, 0), **const_block_kwargs),  # W1^T
                pl.BlockSpec((1, D), lambda i: (0, 0), **const_block_kwargs),  # b1
                pl.BlockSpec((D, D), lambda i: (0, 0), **const_block_kwargs),  # W2^T
                pl.BlockSpec((1, D), lambda i: (0, 0), **const_block_kwargs),  # b2
            ],
            out_specs=pl.BlockSpec((tm, D), lambda i: (i, 0)),
        ),
        compiler_params=pltpu.CompilerParams(
            dimension_semantics=("parallel",),
            vmem_limit_bytes=vmem_limit,
        ),
        cost_estimate=cost,
    )(x2, w1t, b1r, w2t, b2r)

    return out.reshape(orig_shape)


def mlp_reference(x, w1, b1, w2, b2):
    h = x @ w1.T + b1
    h = 0.5 * h * (1.0 + jax.lax.erf(h / jnp.sqrt(2.0)))
    return h @ w2.T + b2


if __name__ == "__main__":
    key = jax.random.PRNGKey(0)
    batch, seq, dim = 2, 8, 32
    k_x, k_w1, k_b1, k_w2, k_b2 = jax.random.split(key, 5)

    # Deterministic parameter init (mimicking nn.Linear's U(-1/sqrt(dim), 1/sqrt(dim)))
    bound = 1.0 / math.sqrt(dim)
    w1 = jax.random.uniform(k_w1, (dim, dim), jnp.float32, -bound, bound)
    b1 = jax.random.uniform(k_b1, (dim,), jnp.float32, -bound, bound)
    w2 = jax.random.uniform(k_w2, (dim, dim), jnp.float32, -bound, bound)
    b2 = jax.random.uniform(k_b2, (dim,), jnp.float32, -bound, bound)

    x = jax.random.normal(k_x, (batch, seq, dim), jnp.float32)

    ref = mlp_reference(x, w1, b1, w2, b2)

    # Exact-precision path (f32 MXU operands) -- tight tolerance vs reference.
    out = mlp_forward(x, w1, b1, w2, b2)
    jax.block_until_ready(out)
    assert out.shape == ref.shape
    assert jnp.allclose(out, ref, atol=1e-5, rtol=1e-5), "f32 path mismatch vs reference"

    # Opt-in bf16-MXU fast path -- looser tolerance (bf16 operand rounding).
    out_bf16 = mlp_forward(x, w1, b1, w2, b2, use_bf16_matmul=True)
    jax.block_until_ready(out_bf16)
    assert out_bf16.shape == ref.shape
    assert jnp.allclose(out_bf16, ref, atol=5e-2, rtol=5e-2), "bf16 path mismatch vs reference"

    print("KERNEL_OK")
</pallas_src>

<mosaic_0001>
module attributes {stable_mosaic.version = 11 : i64} {
  func.func @mlp_kernel(%arg0: i32, %arg1: memref<16x32xf32, #tpu.memory_space<vmem>>, %arg2: memref<32x32xf32, #tpu.memory_space<vmem>>, %arg3: memref<1x32xf32, #tpu.memory_space<vmem>>, %arg4: memref<32x32xf32, #tpu.memory_space<vmem>>, %arg5: memref<1x32xf32, #tpu.memory_space<vmem>>, %arg6: memref<16x32xf32, #tpu.memory_space<vmem>>) attributes {dimension_semantics = [#tpu.dimension_semantics<parallel>], iteration_bounds = array<i64: 1>, scalar_prefetch = 0 : i64, scratch_operands = 0 : i64, tpu.core_type = #tpu.core_type<tc>, window_params = [{transform_indices = @transform_0, window_bounds = array<i64: 16, 32>}, {pipeline_mode = #tpu.pipeline_mode<synchronous>, transform_indices = @transform_1, window_bounds = array<i64: 32, 32>}, {pipeline_mode = #tpu.pipeline_mode<synchronous>, transform_indices = @transform_2, window_bounds = array<i64: 1, 32>}, {pipeline_mode = #tpu.pipeline_mode<synchronous>, transform_indices = @transform_3, window_bounds = array<i64: 32, 32>}, {pipeline_mode = #tpu.pipeline_mode<synchronous>, transform_indices = @transform_4, window_bounds = array<i64: 1, 32>}, {transform_indices = @transform_5, window_bounds = array<i64: 16, 32>}]} {
    %c0 = arith.constant 0 : index
    %c0_0 = arith.constant 0 : index
    %0 = vector.load %arg1[%c0, %c0_0] : memref<16x32xf32, #tpu.memory_space<vmem>>, vector<16x32xf32>
    %c0_1 = arith.constant 0 : index
    %c0_2 = arith.constant 0 : index
    %1 = vector.load %arg2[%c0_1, %c0_2] : memref<32x32xf32, #tpu.memory_space<vmem>>, vector<32x32xf32>
    %cst = arith.constant dense<0.000000e+00> : vector<16x32xf32>
    %2 = tpu.matmul %0, %1, %cst {dimension_numbers = #tpu.dot_dimension_numbers<[1], [0], [0], [1], [0, 0, 1, 1], [], []>} : vector<16x32xf32>, vector<32x32xf32>, vector<16x32xf32> -> vector<16x32xf32>
    %c0_3 = arith.constant 0 : index
    %c0_4 = arith.constant 0 : index
    %3 = vector.load %arg3[%c0_3, %c0_4] : memref<1x32xf32, #tpu.memory_space<vmem>>, vector<1x32xf32>
    %4 = vector.broadcast %3 : vector<1x32xf32> to vector<16x32xf32>
    %5 = arith.addf %2, %4 : vector<16x32xf32>
    %cst_5 = arith.constant 5.000000e-01 : f32
    %6 = vector.broadcast %cst_5 : f32 to vector<16x32xf32>
    %7 = arith.mulf %6, %5 : vector<16x32xf32>
    %cst_6 = arith.constant 0.707106769 : f32
    %8 = vector.broadcast %cst_6 : f32 to vector<16x32xf32>
    %9 = arith.mulf %5, %8 : vector<16x32xf32>
    %10 = math.erf %9 : vector<16x32xf32>
    %cst_7 = arith.constant 1.000000e+00 : f32
    %11 = vector.broadcast %cst_7 : f32 to vector<16x32xf32>
    %12 = arith.addf %11, %10 : vector<16x32xf32>
    %13 = arith.mulf %7, %12 : vector<16x32xf32>
    %c0_8 = arith.constant 0 : index
    %c0_9 = arith.constant 0 : index
    %14 = vector.load %arg4[%c0_8, %c0_9] : memref<32x32xf32, #tpu.memory_space<vmem>>, vector<32x32xf32>
    %cst_10 = arith.constant dense<0.000000e+00> : vector<16x32xf32>
    %15 = tpu.matmul %13, %14, %cst_10 {dimension_numbers = #tpu.dot_dimension_numbers<[1], [0], [0], [1], [0, 0, 1, 1], [], []>} : vector<16x32xf32>, vector<32x32xf32>, vector<16x32xf32> -> vector<16x32xf32>
    %c0_11 = arith.constant 0 : index
    %c0_12 = arith.constant 0 : index
    %16 = vector.load %arg5[%c0_11, %c0_12] : memref<1x32xf32, #tpu.memory_space<vmem>>, vector<1x32xf32>
    %17 = vector.broadcast %16 : vector<1x32xf32> to vector<16x32xf32>
    %18 = arith.addf %15, %17 : vector<16x32xf32>
    %c0_13 = arith.constant 0 : index
    %c0_14 = arith.constant 0 : index
    %19 = vector.load %arg6[%c0_13, %c0_14] : memref<16x32xf32, #tpu.memory_space<vmem>>, vector<16x32xf32>
    tpu.vector_store %arg6[%c0_13, %c0_14], %18 {strides = array<i32>} : memref<16x32xf32, #tpu.memory_space<vmem>>, vector<16x32xf32>,
    return
  }
  func.func @transform_0(%arg0: i32) -> (i32, i32) {
    %c0_i32 = arith.constant 0 : i32
    %c0_i32_0 = arith.constant 0 : i32
    return %arg0, %c0_i32 : i32, i32
  }
  func.func @transform_1(%arg0: i32) -> (i32, i32) {
    %c0_i32 = arith.constant 0 : i32
    %c0_i32_0 = arith.constant 0 : i32
    %c0_i32_1 = arith.constant 0 : i32
    return %c0_i32, %c0_i32_0 : i32, i32
  }
  func.func @transform_2(%arg0: i32) -> (i32, i32) {
    %c0_i32 = arith.constant 0 : i32
    %c0_i32_0 = arith.constant 0 : i32
    %c0_i32_1 = arith.constant 0 : i32
    return %c0_i32, %c0_i32_0 : i32, i32
  }
  func.func @transform_3(%arg0: i32) -> (i32, i32) {
    %c0_i32 = arith.constant 0 : i32
    %c0_i32_0 = arith.constant 0 : i32
    %c0_i32_1 = arith.constant 0 : i32
    return %c0_i32, %c0_i32_0 : i32, i32
  }
  func.func @transform_4(%arg0: i32) -> (i32, i32) {
    %c0_i32 = arith.constant 0 : i32
    %c0_i32_0 = arith.constant 0 : i32
    %c0_i32_1 = arith.constant 0 : i32
    return %c0_i32, %c0_i32_0 : i32, i32
  }
  func.func @transform_5(%arg0: i32) -> (i32, i32) {
    %c0_i32 = arith.constant 0 : i32
    %c0_i32_0 = arith.constant 0 : i32
    return %arg0, %c0_i32 : i32, i32
  }
}

</mosaic_0001>

<bundles_post_ra>
// kernel: tpu_custom_call.1
= control target key start
LH: loop header
LB: loop body
LE: loop exit
PB: predicated region body
PF: predicated region fallthrough
CT: control target
= control target key end

     0   :  { %10 = vsyncpa [#allocation3], 0  ;;  %s554_s0 = inlined_call_operand.hbm [shape: f32[16,32], index: 0, kind: input, shape index: {}]   ;;  %s555_s1 = inlined_call_operand.hbm [shape: f32[32,32], index: 1, kind: input, shape index: {}]   ;;  %s556_s2 = inlined_call_operand.vmem [shape: f32[1,32], index: 2, kind: input, shape index: {}]   ;;  %s557_s3 = inlined_call_operand.hbm [shape: f32[32,32], index: 3, kind: input, shape index: {}]   ;;  %s558_s4 = inlined_call_operand.vmem [shape: f32[1,32], index: 4, kind: input, shape index: {}]   ;;  %s559_s5 = inlined_call_operand.hbm [shape: f32[16,32], index: 5, kind: output, shape index: {}]  }
   0x1   :  { %11 = vsyncpa [#allocation6], 0 }
   0x2   :  { %12 = vsyncpa [#allocation4], 0  ;;  %s439_s18 = smov [#allocation5]   ;;  %s440_s20 = smov [#allocation2]  }
   0x3   :  { %s30_s19 = sshll.u32 %s439_s18, 4  ;;  %s18_s21 = sshll.u32 %s440_s20, 4  ;;  %s31_s19 = int_to_ptr.vmem [resolvable:$true] %s30_s19  ;;  %s475_s21 = int_to_ptr.vmem [resolvable:$true] %s18_s21 }
   0x4   :  { %s345_s24 = scalar_lea.hbm %s555_s1, 512 }
   0x5   :  { %p346_p0 = scmp.ne.s32.totalorder %s555_s1, %s345_s24  ;;  %p349_p1 = scmp.lt.u32.totalorder %s345_s24, %s555_s1 }
   0x7   :  { %p351_p2 = pnand %p349_p1, %p346_p0 }
   0x9   :  { %354 = shalt.err (!%p351_p2)
}
   0xa   :  { %s355_s29 = scalar_lea.vmem %s31_s19, 512  ;;  %p360_p4 = scmp.lt.s32.totalorder %s31_s19, %s31_s19 }
   0xb   :  { %p356_p3 = scmp.ne.s32.totalorder %s31_s19, %s355_s29  ;;  %p361_p5 = scmp.lt.s32.totalorder %s355_s29, %s355_s29 }
   0xd   :  { %p362_p6 = por %p361_p5, %p360_p4 }
   0xf   :  { %p363_p7 = pnand %p362_p6, %p356_p3 }
  0x11   :  { %366 = shalt.err (!%p363_p7)
}
  0x12   :  { %s441_s30 = smov 128   ;;  %s442_s6 = smov 8  }
  0x13   :  { %36 = dma.hbm_to_vmem [thread:$0]  %s555_s1, 512, %s31_s19, [#allocation6], %s441_s30, %s441_s30, %s442_s6  }
  0x14   :  { %s367_s11 = scalar_lea.hbm %s554_s0, 256 }
  0x15   :  { %p368_p8 = scmp.ne.s32.totalorder %s554_s0, %s367_s11  ;;  %p371_p9 = scmp.lt.u32.totalorder %s367_s11, %s554_s0 }
  0x17   :  { %p373_p10 = pnand %p371_p9, %p368_p8 }
  0x19   :  { %376 = shalt.err (!%p373_p10)
}
  0x1a   :  { %s377_s16 = scalar_lea.vmem %s475_s21, 256  ;;  %p382_p12 = scmp.lt.s32.totalorder %s475_s21, %s475_s21 }
  0x1b   :  { %p378_p11 = scmp.ne.s32.totalorder %s475_s21, %s377_s16  ;;  %p383_p13 = scmp.lt.s32.totalorder %s377_s16, %s377_s16 }
  0x1d   :  { %p384_p0 = por %p383_p13, %p382_p12 }
  0x1f   :  { %p385_p1 = pnand %p384_p0, %p378_p11 }
  0x21   :  { %388 = shalt.err (!%p385_p1)
}
  0x22   :  { %24 = dma.hbm_to_vmem [thread:$0]  %s554_s0, 256, %s475_s21, [#allocation3], %s441_s30, %s441_s30, %s442_s6  }
  0x23   :  { %s443_s18 = smov [#allocation7]   ;;  %s389_s23 = scalar_lea.hbm %s557_s3, 512 }
  0x24   :  { %s44_s19 = sshll.u32 %s443_s18, 4  ;;  %p390_p2 = scmp.ne.s32.totalorder %s557_s3, %s389_s23  ;;  %s45_s19 = int_to_ptr.vmem [resolvable:$true] %s44_s19 }
  0x25   :  { %p393_p3 = scmp.lt.u32.totalorder %s389_s23, %s557_s3 }
  0x27   :  { %p395_p4 = pnand %p393_p3, %p390_p2 }
  0x29   :  { %398 = shalt.err (!%p395_p4)
}
  0x2a   :  { %s399_s28 = scalar_lea.vmem %s45_s19, 512  ;;  %p404_p6 = scmp.lt.s32.totalorder %s45_s19, %s45_s19 }
  0x2b   :  { %p400_p5 = scmp.ne.s32.totalorder %s45_s19, %s399_s28  ;;  %p405_p7 = scmp.lt.s32.totalorder %s399_s28, %s399_s28 }
  0x2d   :  { %p406_p8 = por %p405_p7, %p404_p6 }
  0x2f   :  { %p407_p9 = pnand %p406_p8, %p400_p5 }
  0x31   :  { %410 = shalt.err (!%p407_p9)
}
  0x32   :  { %50 = dma.hbm_to_vmem [thread:$0]  %s557_s3, 512, %s45_s19, [#allocation6], %s441_s30, %s441_s30, %s442_s6  }
  0x33   :  { %433 = dma.done.wait [#allocation3], 256  }
  0x34   :  { %434 = vsyncadd [#allocation3], 4294967040 }
  0x35   :  { %435 = dma.done.wait [#allocation6], 1024  }
  0x36   :  { %436 = vsyncadd [#allocation6], 4294966272  ;;  %vm75_vm0 = vcmask 261120   ;;  %v64_v0 = vld [vmem:[#allocation5] sm:$0xff]  ;;  %v65_v1 = vld [vmem:[#allocation5 + $0x8] sm:$0xff]  ;;  %s444_s8 = smov [#allocation8]  }
  0x37   :  { %v66_v2 = vld [vmem:[#allocation5 + $0x10] sm:$0xff]  ;;  %v319_v3 = vpack.c.bf16 %v65_v1, %v64_v0  ;;  %v67_v4 = vld [vmem:[#allocation5 + $0x18] sm:$0xff]  ;;  %v167_v8 = vld [vmem:[#allocation7] sm:$0xff]  ;;  %s266_s9 = sshll.u32 %s444_s8, 4  ;;  %s267_s9 = int_to_ptr.vmem [resolvable:$true] %s266_s9 }
  0x38   :  { %v62_v5 = vld [vmem:[#allocation2] sm:$0xff]  ;;  %v323_v6 = vpack.c.bf16 %v67_v4, %v66_v2  ;;  %v63_v7 = vld [vmem:[#allocation2 + $0x8] sm:$0xff]  ;;  %v168_v9 = vld [vmem:[#allocation7 + $0x8] sm:$0xff]  ;;  %s411_s10 = scalar_lea.vmem %s267_s9, 256  ;;  %p416_p11 = scmp.lt.s32.totalorder %s267_s9, %s267_s9 }
  0x39   :  { %305 = vmatprep.mubr.msk.f32.mxu0 %vm75_vm0, %v62_v5  ;;  %320 = vmatprep.subr.bf16.mxu0 %v319_v3  ;;  %v327_v10 = vpack.c.bf16 %v168_v9, %v167_v8  ;;  %v169_v11 = vld [vmem:[#allocation7 + $0x10] sm:$0xff]  ;;  %v170_v12 = vld [vmem:[#allocation7 + $0x18] sm:$0xff]  ;;  %p412_p10 = scmp.ne.s32.totalorder %s267_s9, %s411_s10  ;;  %p417_p12 = scmp.lt.s32.totalorder %s411_s10, %s411_s10 }
  0x3a   :  { %322 = vmatpush3.bf16.msra.mxu0 %v319_v3  ;;  %v331_v13 = vpack.c.bf16 %v170_v12, %v169_v11  ;;  %v279_v14 = vld [vmem:[%s556_s2] ss:$0 sm:$0xff] }
  0x3b   :  { %324 = vmatprep.subr.bf16.mxu0 %v323_v6  ;;  %328 = vmatprep.subr.bf16.mxu1 %v327_v10  ;;  %v282_v29 = vld [vmem:[%s558_s4] ss:$0 sm:$0xff]  ;;  %p418_p13 = por %p417_p12, %p416_p11 }
  0x3c   :  { %330 = vmatpush3.bf16.msra.mxu1 %v327_v10 }
  0x3d   :  { %332 = vmatprep.subr.bf16.mxu1 %v331_v13  ;;  %p419_p0 = pnand %p418_p13, %p412_p10 }
  0x3e   :  { %326 = vmatpush3.bf16.msra.mxu0 %v323_v6 }
  0x40   :  { %334 = vmatpush3.bf16.msra.mxu1 %v331_v13 }
  0x41   :  { %306 = vmatmul.mubr.msk.f32.vlgmr.msra.gmra.mrb[0].mxu0 %vm75_vm0, %v63_v7 }
 0x114   :  { %v307_v15 = vpop.f32.mrb[0].mxu0 }
 0x115   :  { %v154_v16 = vadd.f32 %v307_v15, %v279_v14  ;;  %v148_v17 = vpop.f32.mrb[1].mxu0 }
 0x116   :  { %v149_v18 = vadd.f32 %v279_v14, %v148_v17 }
 0x117   :  { %v160_v19 = vmul.f32 0.70710677, %v154_v16  ;;  %v158_v26 = vmul.f32 0.5, %v154_v16 }
 0x118   :  { %v159_v20 = vmul.f32 0.70710677, %v149_v18  ;;  %v157_v24 = vmul.f32 0.5, %v149_v18 }
 0x119   :  { %341 = verf.f32 %v160_v19 }
 0x11a   :  { %343 = verf.f32 %v159_v20 }
 0x123   :  { %v342_v21 = vpop.eup %341 }
 0x124   :  { %v344_v22 = vpop.eup %343  ;;  %v164_v23 = vadd.f32 1.0, %v342_v21 }
 0x125   :  { %v163_v25 = vadd.f32 1.0, %v344_v22 }
 0x126   :  { %v166_v28 = vmul.f32 %v164_v23, %v158_v26 }
 0x127   :  { %v165_v27 = vmul.f32 %v163_v25, %v157_v24 }
 0x129   :  { %316 = vmatprep.mubr.msk.f32.mxu1 %vm75_vm0, %v165_v27 }
 0x12a   :  { %317 = vmatmul.mubr.msk.f32.vlgmr.msra.gmra.mrb[0].mxu1 %vm75_vm0, %v166_v28 }
 0x1fd   :  { %v318_v30 = vpop.f32.mrb[0].mxu1 }
 0x1fe   :  { %v256_v31 = vadd.f32 %v318_v30, %v282_v29  ;;  %v250_v32 = vpop.f32.mrb[1].mxu1 }
 0x1ff   :  { %v251_v33 = vadd.f32 %v282_v29, %v250_v32 }
 0x200   :  { %260 = vst.msk [vmem:[#allocation8 + $0x8] sm:$0xff] %vm75_vm0, %v256_v31 }
 0x201   :  { %259 = vst.msk [vmem:[#allocation8] sm:$0xff] %vm75_vm0, %v251_v33 }
 0x202   :  { %422 = shalt.err (!%p419_p0)
}
 0x203   :  { %s423_s12 = scalar_lea.hbm %s559_s5, 256 }
 0x204   :  { %p424_p1 = scmp.ne.s32.totalorder %s559_s5, %s423_s12  ;;  %p427_p2 = scmp.lt.u32.totalorder %s423_s12, %s559_s5 }
 0x206   :  { %p429_p3 = pnand %p427_p2, %p424_p1 }
 0x208   :  { %432 = shalt.err (!%p429_p3)
}
 0x209   :  { %272 = dma.vmem_to_hbm [thread:$0]  %s267_s9, 256, %s559_s5, [#allocation4], %s441_s30, %s441_s30, %s442_s6  }
 0x20a   :  { %437 = dma.done.wait [#allocation4], 256  }
 0x20b   :  { %438 = vsyncadd [#allocation4], 4294967040 }
 0x20c   :  { %276 = vsyncpa [#allocation3], 1 }
 0x20d   :  { %277 = vsyncpa [#allocation6], 1 }
 0x20e   :  { %278 = vsyncpa [#allocation4], 1 }

</bundles_post_ra>
